<compile_context>
chip_gen: v7x
topology: tpu7x:2x2x1
jax: 0.10.0
libtpu: 0.0.40
codegen_flags: <defaults>
</compile_context>

<pallas_src>
import functools

import numpy as np
import jax
import jax.numpy as jnp
from jax import lax
from jax.experimental import pallas as pl
from jax.experimental.pallas import tpu as pltpu

EPS = 1e-6  # nn.PairwiseDistance default eps: || x1 - x2 + eps ||_2


def _round_up(x, m):
    return (x + m - 1) // m * m


def _device_kind():
    try:
        return jax.devices()[0].device_kind.lower()
    except Exception:
        return ""


def _has_wide_mxu():
    # v6e / v7x have 256-wide MXUs; be conservative otherwise.
    k = _device_kind()
    return ("v6" in k) or ("v7" in k)


# ----------------------------------------------------------------------------
# Fused single-pass kernel (per user tile, full item axis resident):
#   user_mean = interact_vals @ item_agg                       (MXU)
#   dist      = || item_agg - user_mean + eps ||_2             (matmul expansion)
#   attn      = sparse row-softmax(dist / T) over the pattern  (VPU/EUP)
#   user_agg  = attn @ item_agg                                (MXU)
# ----------------------------------------------------------------------------
def _fused_user_kernel(*refs, inv_temp, dim_actual, eps, has_mask):
    if has_mask:
        vals_ref, mask_ref, item_ref, const_ref, o_ref = refs
    else:
        vals_ref, item_ref, const_ref, o_ref = refs
        mask_ref = None

    vals = vals_ref[...]                                  # [tu, I] bf16
    ia = item_ref[...]                                    # [I,  D] bf16
    c_i = const_ref[...][0:1, :]                          # [1,  I] f32 (precomputed)

    # user_mean = interact_map @ item_agg  (fused; f32 accumulate on MXU)
    um = jnp.dot(vals, ia, preferred_element_type=jnp.float32)       # [tu, D]

    # ||ia - um + eps||^2 = c_i + (||um||^2 - 2*eps*sum(um) + D*eps^2) - 2<um, ia>
    r_u = (jnp.sum(um * um, axis=1, keepdims=True)
           - 2.0 * eps * jnp.sum(um, axis=1, keepdims=True)
           + dim_actual * eps * eps)                                 # [tu, 1]
    # Contract the D axes in place (no ia.T / XLU transpose).
    cross = lax.dot_general(um.astype(jnp.bfloat16), ia,
                            (((1,), (1,)), ((), ())),
                            preferred_element_type=jnp.float32)      # [tu, I]
    d2 = r_u + c_i - 2.0 * cross
    dist = jnp.sqrt(jnp.maximum(d2, 0.0))

    if has_mask:
        mask = mask_ref[...] != 0
    else:
        mask = vals != 0   # sparsity pattern == nonzero interactions

    logits = jnp.where(mask, dist * inv_temp, -1e30)
    row_max = jnp.max(logits, axis=1, keepdims=True)
    p = jnp.exp(logits - row_max) * mask.astype(jnp.float32)
    denom = jnp.sum(p, axis=1, keepdims=True)
    denom = jnp.where(denom <= 0.0, 1.0, denom)          # padded / empty rows
    attn = p * pl.reciprocal(denom, approx=True)

    o_ref[...] = jnp.dot(attn.astype(jnp.bfloat16), ia,
                         preferred_element_type=jnp.float32).astype(o_ref.dtype)


# ----------------------------------------------------------------------------
# Item-tiled kernel with online (flash-style) softmax.
# grid = (n_user_tiles, n_item_tiles); item axis last, "arbitrary".
# user_mean is precomputed outside (full item reduction needed before any
# distance), streamed per user tile.
# ----------------------------------------------------------------------------
def _tiled_user_kernel(*refs, inv_temp, dim_actual, eps, has_mask):
    if has_mask:
        (vals_ref, mask_ref, um_ref, item_ref, const_ref,
         o_ref, m_sc, l_sc, acc_sc) = refs
    else:
        (vals_ref, um_ref, item_ref, const_ref,
         o_ref, m_sc, l_sc, acc_sc) = refs
        mask_ref = None

    k = pl.program_id(1)

    @pl.when(k == 0)
    def _():
        m_sc[...] = jnp.full_like(m_sc, -1e30)
        l_sc[...] = jnp.zeros_like(l_sc)
        acc_sc[...] = jnp.zeros_like(acc_sc)

    vals = vals_ref[...]                                  # [tu, ti] bf16
    ia = item_ref[...]                                    # [ti, D]  bf16
    um = um_ref[...]                                      # [tu, D]  f32
    c_i = const_ref[...][0:1, :]                          # [1, ti]  f32

    r_u = (jnp.sum(um * um, axis=1, keepdims=True)
           - 2.0 * eps * jnp.sum(um, axis=1, keepdims=True)
           + dim_actual * eps * eps)                      # [tu, 1]
    cross = lax.dot_general(um.astype(jnp.bfloat16), ia,
                            (((1,), (1,)), ((), ())),
                            preferred_element_type=jnp.float32)      # [tu, ti]
    d2 = r_u + c_i - 2.0 * cross
    dist = jnp.sqrt(jnp.maximum(d2, 0.0))

    if has_mask:
        mask = mask_ref[...] != 0
    else:
        mask = vals != 0
    logits = jnp.where(mask, dist * inv_temp, -1e30)

    # online softmax over the item axis
    m_prev = m_sc[...]
    m_new = jnp.maximum(m_prev, jnp.max(logits, axis=1, keepdims=True))
    alpha = jnp.exp(m_prev - m_new)
    p = jnp.exp(logits - m_new) * mask.astype(jnp.float32)
    l_sc[...] = alpha * l_sc[...] + jnp.sum(p, axis=1, keepdims=True)
    acc_sc[...] = alpha * acc_sc[...] + jnp.dot(p.astype(jnp.bfloat16), ia,
                                                preferred_element_type=jnp.float32)
    m_sc[...] = m_new

    @pl.when(k == pl.num_programs(1) - 1)
    def _():
        denom = jnp.where(l_sc[...] <= 0.0, 1.0, l_sc[...])
        o_ref[...] = (acc_sc[...] * pl.reciprocal(denom, approx=True)
                      ).astype(o_ref.dtype)


# ----------------------------------------------------------------------------
# Host wrapper: padding, tile selection, path selection, pallas_call plumbing.
# ----------------------------------------------------------------------------
def pallas_user_agg(interact_vals, item_agg, temperature, *,
                    interact_mask=None, out_dtype=jnp.float32,
                    force_tiled=False, item_tile=512):
    U, I = interact_vals.shape
    I2, D = item_agg.shape
    assert I == I2
    has_mask = interact_mask is not None

    i_pad = _round_up(I, 128)
    d_pad = _round_up(D, 128)

    # Per-item constants (invariant across user tiles), computed ONCE in f32:
    #   c_i = ||ia_i||^2 + 2*eps*sum(ia_i)
    ia32 = item_agg.astype(jnp.float32)
    c = jnp.sum(ia32 * ia32, axis=1) + 2.0 * EPS * jnp.sum(ia32, axis=1)   # [I]
    const_p = jnp.zeros((8, i_pad), jnp.float32).at[:, :I].set(c)

    # TODO(synk): ideally vals/mask arrive pre-padded bf16 from the data layer;
    # the pad+cast below is skipped when they already are.
    def _pad2(x, shape, dtype):
        if tuple(x.shape) == shape and x.dtype == dtype:
            return x
        return jnp.zeros(shape, dtype).at[:x.shape[0], :x.shape[1]].set(
            x.astype(dtype))

    item_p = _pad2(item_agg, (i_pad, d_pad), jnp.bfloat16)

    # User tile: 256 on 256-wide-MXU chips (v6e/v7x) for large U, else 128;
    # small problems collapse to one 8-aligned tile.
    if U <= 128:
        tu = _round_up(max(U, 8), 8)
    elif U <= 256 or not _has_wide_mxu():
        tu = 128
    else:
        tu = 256
    u_pad = _round_up(U, tu)

    vals_p = _pad2(interact_vals, (u_pad, i_pad), jnp.bfloat16)
    mask_p = (_pad2(interact_mask, (u_pad, i_pad), jnp.bfloat16)
              if has_mask else None)

    out_itemsize = jnp.dtype(out_dtype).itemsize
    kernel_kwargs = dict(inv_temp=float(1.0 / temperature),
                         dim_actual=int(D), eps=float(EPS),
                         has_mask=has_mask)

    # ---- fused single-pass path (full item axis resident in VMEM) ---------
    est_fused = (2 * tu * i_pad * 2 * (2 if has_mask else 1)   # vals(+mask)
                 + 2 * i_pad * d_pad * 2                       # item block
                 + 2 * 8 * i_pad * 4                           # const rows
                 + 2 * tu * d_pad * out_itemsize               # out tile
                 + 6 * tu * i_pad * 4)                         # f32 temporaries
    if not force_tiled and est_fused <= (24 << 20):            # v7x-safe budget
        in_specs = [pl.BlockSpec((tu, i_pad), lambda u: (u, 0))]
        inputs = [vals_p]
        if has_mask:
            in_specs.append(pl.BlockSpec((tu, i_pad), lambda u: (u, 0)))
            inputs.append(mask_p)
        in_specs += [pl.BlockSpec((i_pad, d_pad), lambda u: (0, 0)),
                     pl.BlockSpec((8, i_pad), lambda u: (0, 0))]
        inputs += [item_p, const_p]
        out = pl.pallas_call(
            functools.partial(_fused_user_kernel, **kernel_kwargs),
            out_shape=jax.ShapeDtypeStruct((u_pad, d_pad), out_dtype),
            grid=(u_pad // tu,),
            in_specs=in_specs,
            out_specs=pl.BlockSpec((tu, d_pad), lambda u: (u, 0)),
            compiler_params=pltpu.CompilerParams(
                dimension_semantics=("parallel",),
                vmem_limit_bytes=int(min(max(2 * est_fused, 32 << 20),
                                         56 << 20))),
        )(*inputs)
        return out[:U, :D]

    # ---- item-tiled path with online softmax -------------------------------
    ti = min(_round_up(item_tile, 128), i_pad)
    while i_pad % ti:
        ti -= 128

    # user_mean needs the full item reduction before any distance, so compute
    # it once outside the kernel (single bf16 MXU matmul, f32 accumulate).
    um_p = lax.dot(vals_p, item_p, preferred_element_type=jnp.float32)

    in_specs = [pl.BlockSpec((tu, ti), lambda u, k: (u, k))]
    inputs = [vals_p]
    if has_mask:
        in_specs.append(pl.BlockSpec((tu, ti), lambda u, k: (u, k)))
        inputs.append(mask_p)
    in_specs += [pl.BlockSpec((tu, d_pad), lambda u, k: (u, 0)),
                 pl.BlockSpec((ti, d_pad), lambda u, k: (k, 0)),
                 pl.BlockSpec((8, ti), lambda u, k: (0, k))]
    inputs += [um_p, item_p, const_p]

    est_tiled = (2 * tu * ti * 2 * (2 if has_mask else 1)
                 + 2 * tu * d_pad * 4
                 + 2 * ti * d_pad * 2
                 + 2 * 8 * ti * 4
                 + 2 * tu * d_pad * out_itemsize
                 + tu * d_pad * 4 + 2 * tu * 4
                 + 6 * tu * ti * 4)
    out = pl.pallas_call(
        functools.partial(_tiled_user_kernel, **kernel_kwargs),
        out_shape=jax.ShapeDtypeStruct((u_pad, d_pad), out_dtype),
        grid=(u_pad // tu, i_pad // ti),
        in_specs=in_specs,
        out_specs=pl.BlockSpec((tu, d_pad), lambda u, k: (u, 0)),
        scratch_shapes=[pltpu.VMEM((tu, 1), jnp.float32),
                        pltpu.VMEM((tu, 1), jnp.float32),
                        pltpu.VMEM((tu, d_pad), jnp.float32)],
        compiler_params=pltpu.CompilerParams(
            dimension_semantics=("parallel", "arbitrary"),
            vmem_limit_bytes=int(min(max(2 * est_tiled, 32 << 20),
                                     56 << 20))),
    )(*inputs)
    return out[:U, :D]


# ----------------------------------------------------------------------------
# Aggregator.forward equivalent
#   entity_emb     [n_entities, D]    f32
#   edge_index     [2, n_edges]       int32 (head, tail)
#   interact_vals  [n_users, n_items] dense values of sparse interact_map
#   interact_mask  optional 0/1 pattern (None -> derived from vals != 0)
# edge_type / weight are unused by the PyTorch forward and are omitted.
# ----------------------------------------------------------------------------
def aggregator_forward(entity_emb, edge_index, interact_vals, n_items,
                       temperature, *, interact_mask=None,
                       out_dtype=jnp.float32, force_tiled=False,
                       item_tile=512):
    n_entities, dim = entity_emb.shape
    head, tail = edge_index[0], edge_index[1]

    # entity_agg = scatter_mean(entity_emb[tail], head): O(E*D) scatter-add.
    # TODO(synk): a Pallas segment-sum over sorted edges (scalar-prefetched
    # offsets) could replace this XLA scatter; kept in XLA for now.
    neigh = entity_emb[tail]                                          # [E, D]
    sums = jnp.zeros((n_entities, dim), jnp.float32).at[head].add(neigh)
    cnt = jnp.zeros((n_entities,), jnp.float32).at[head].add(1.0)
    entity_agg = sums / jnp.maximum(cnt, 1.0)[:, None]                # [N, D]
    item_agg = entity_agg[:n_items]                                   # [I, D]

    user_agg = pallas_user_agg(interact_vals, item_agg, temperature,
                               interact_mask=interact_mask,
                               out_dtype=out_dtype,
                               force_tiled=force_tiled,
                               item_tile=item_tile)                   # [U, D]
    return user_agg, entity_agg


# ----------------------------------------------------------------------------
# Pure-JAX reference (direct-diff distance, f32 throughout).
# ----------------------------------------------------------------------------
def reference_forward(entity_emb, edge_index, interact_vals, interact_mask,
                      n_items, temperature):
    n_entities, dim = entity_emb.shape
    head, tail = edge_index[0], edge_index[1]
    neigh = entity_emb[tail]
    sums = jnp.zeros((n_entities, dim), jnp.float32).at[head].add(neigh)
    cnt = jnp.zeros((n_entities,), jnp.float32).at[head].add(1.0)
    entity_agg = sums / jnp.maximum(cnt, 1.0)[:, None]
    item_agg = entity_agg[:n_items]
    user_mean = interact_vals @ item_agg
    diff = item_agg[None, :, :] - user_mean[:, None, :] + EPS
    dist = jnp.sqrt(jnp.sum(diff * diff, axis=-1))
    logits = dist / temperature
    masked = jnp.where(interact_mask > 0, logits, -1e30)
    row_max = jnp.max(masked, axis=1, keepdims=True)
    p = jnp.exp(masked - row_max) * interact_mask
    denom = jnp.sum(p, axis=1, keepdims=True)
    denom = jnp.where(denom == 0.0, 1.0, denom)
    user_agg = (p / denom) @ item_agg
    return user_agg, entity_agg


if __name__ == "__main__":
    # ---- Test 1: small shapes, fused path ---------------------------------
    n_entities, n_items, n_users = 64, 32, 16
    dim, n_edges, temperature = 128, 256, 2.0
    k1, k2, k3, k4 = jax.random.split(jax.random.PRNGKey(0), 4)
    entity_emb = 0.1 * jax.random.normal(k1, (n_entities, dim), jnp.float32)
    head = jax.random.randint(k2, (n_edges,), 0, n_entities, dtype=jnp.int32)
    tail = jax.random.randint(k3, (n_edges,), 0, n_entities, dtype=jnp.int32)
    edge_index = jnp.stack([head, tail])
    interact_mask = (jax.random.uniform(k4, (n_users, n_items)) < 0.3
                     ).astype(jnp.float32)
    interact_mask = interact_mask.at[
        jnp.arange(n_users), jnp.arange(n_users) % n_items].set(1.0)
    interact_vals = interact_mask   # binary: pattern == nonzero values

    ref_user, ref_entity = reference_forward(
        entity_emb, edge_index, interact_vals, interact_mask,
        n_items, temperature)

    # 1a: mask derived in-kernel from vals != 0
    user_agg, entity_agg = aggregator_forward(
        entity_emb, edge_index, interact_vals, n_items, temperature)
    jax.block_until_ready((user_agg, entity_agg))
    assert user_agg.shape == (n_users, dim)
    assert entity_agg.shape == (n_entities, dim)
    assert np.allclose(np.asarray(entity_agg), np.asarray(ref_entity),
                       atol=2e-2, rtol=2e-2)
    assert np.allclose(np.asarray(user_agg), np.asarray(ref_user),
                       atol=2e-2, rtol=2e-2)

    # 1b: explicit (bf16) mask, fused path
    user_agg_m, _ = aggregator_forward(
        entity_emb, edge_index, interact_vals, n_items, temperature,
        interact_mask=interact_mask)
    jax.block_until_ready(user_agg_m)
    assert np.allclose(np.asarray(user_agg_m), np.asarray(ref_user),
                       atol=2e-2, rtol=2e-2)

    # ---- Test 2: item-tiled online-softmax path ----------------------------
    n_entities, n_items, n_users = 800, 700, 200
    dim, n_edges, temperature = 96, 4000, 2.0
    k1, k2, k3, k4, k5 = jax.random.split(jax.random.PRNGKey(1), 5)
    entity_emb = jax.random.normal(k1, (n_entities, dim), jnp.float32)
    head = jax.random.randint(k2, (n_edges,), 0, n_entities, dtype=jnp.int32)
    tail = jax.random.randint(k3, (n_edges,), 0, n_entities, dtype=jnp.int32)
    edge_index = jnp.stack([head, tail])
    interact_mask = (jax.random.uniform(k4, (n_users, n_items)) < 0.05
                     ).astype(jnp.float32)
    interact_vals = interact_mask * jax.random.uniform(
        k5, (n_users, n_items), minval=0.5, maxval=1.5)

    ref_user, ref_entity = reference_forward(
        entity_emb, edge_index, interact_vals, interact_mask,
        n_items, temperature)

    # 2a: explicit mask, forced tiled path (3 item tiles, 2 user tiles)
    user_agg, entity_agg = aggregator_forward(
        entity_emb, edge_index, interact_vals, n_items, temperature,
        interact_mask=interact_mask, force_tiled=True, item_tile=256)
    jax.block_until_ready((user_agg, entity_agg))
    assert np.allclose(np.asarray(entity_agg), np.asarray(ref_entity),
                       atol=2e-2, rtol=2e-2)
    assert np.allclose(np.asarray(user_agg), np.asarray(ref_user),
                       atol=2e-2, rtol=2e-2)

    # 2b: derived mask, tiled path
    user_agg_d, _ = aggregator_forward(
        entity_emb, edge_index, interact_vals, n_items, temperature,
        force_tiled=True, item_tile=256)
    jax.block_until_ready(user_agg_d)
    assert np.allclose(np.asarray(user_agg_d), np.asarray(ref_user),
                       atol=2e-2, rtol=2e-2)

    print("KERNEL_OK")
</pallas_src>

<mosaic_0001>
module attributes {stable_mosaic.version = 11 : i64} {
  func.func @_fused_user_kernel(%arg0: i32, %arg1: memref<16x128xbf16, #tpu.memory_space<vmem>>, %arg2: memref<128x128xbf16, #tpu.memory_space<vmem>>, %arg3: memref<8x128xf32, #tpu.memory_space<vmem>>, %arg4: memref<16x128xf32, #tpu.memory_space<vmem>>) attributes {dimension_semantics = [#tpu.dimension_semantics<parallel>], iteration_bounds = array<i64: 1>, scalar_prefetch = 0 : i64, scratch_operands = 0 : i64, tpu.core_type = #tpu.core_type<tc>, window_params = [{transform_indices = @transform_0, window_bounds = array<i64: 16, 128>}, {pipeline_mode = #tpu.pipeline_mode<synchronous>, transform_indices = @transform_1, window_bounds = array<i64: 128, 128>}, {pipeline_mode = #tpu.pipeline_mode<synchronous>, transform_indices = @transform_2, window_bounds = array<i64: 8, 128>}, {transform_indices = @transform_3, window_bounds = array<i64: 16, 128>}]} {
    %c0 = arith.constant 0 : index
    %c0_0 = arith.constant 0 : index
    %0 = vector.load %arg1[%c0, %c0_0] : memref<16x128xbf16, #tpu.memory_space<vmem>>, vector<16x128xbf16>
    %c0_1 = arith.constant 0 : index
    %c0_2 = arith.constant 0 : index
    %1 = vector.load %arg2[%c0_1, %c0_2] : memref<128x128xbf16, #tpu.memory_space<vmem>>, vector<128x128xbf16>
    %c0_3 = arith.constant 0 : index
    %c0_4 = arith.constant 0 : index
    %2 = vector.load %arg3[%c0_3, %c0_4] : memref<8x128xf32, #tpu.memory_space<vmem>>, vector<8x128xf32>
    %3 = vector.extract_strided_slice %2 {offsets = [0, 0], sizes = [1, 128], strides = [1, 1]} : vector<8x128xf32> to vector<1x128xf32>
    %cst = arith.constant dense<0.000000e+00> : vector<16x128xf32>
    %4 = tpu.matmul %0, %1, %cst {dimension_numbers = #tpu.dot_dimension_numbers<[1], [0], [0], [1], [0, 0, 1, 1], [], []>} : vector<16x128xbf16>, vector<128x128xbf16>, vector<16x128xf32> -> vector<16x128xf32>
    %5 = arith.mulf %4, %4 : vector<16x128xf32>
    %cst_5 = arith.constant dense<0.000000e+00> : vector<16xf32>
    %6 = vector.multi_reduction <add>, %5, %cst_5 [1] : vector<16x128xf32> to vector<16xf32>
    %7 = vector.shape_cast %6 : vector<16xf32> to vector<16x1xf32>
    %cst_6 = arith.constant dense<0.000000e+00> : vector<16xf32>
    %8 = vector.multi_reduction <add>, %4, %cst_6 [1] : vector<16x128xf32> to vector<16xf32>
    %9 = vector.shape_cast %8 : vector<16xf32> to vector<16x1xf32>
    %cst_7 = arith.constant 2.000000e-06 : f32
    %10 = vector.broadcast %cst_7 : f32 to vector<16x1xf32>
    %11 = arith.mulf %10, %9 : vector<16x1xf32>
    %12 = arith.subf %7, %11 : vector<16x1xf32>
    %cst_8 = arith.constant 1.280000e-10 : f32
    %13 = vector.broadcast %cst_8 : f32 to vector<16x1xf32>
    %14 = arith.addf %12, %13 : vector<16x1xf32>
    %15 = arith.truncf %4 : vector<16x128xf32> to vector<16x128xbf16>
    %cst_9 = arith.constant dense<0.000000e+00> : vector<16x128xf32>
    %16 = tpu.matmul %15, %1, %cst_9 {dimension_numbers = #tpu.dot_dimension_numbers<[1], [1], [0], [0], [0, 0, 1, 0], [], []>} : vector<16x128xbf16>, vector<128x128xbf16>, vector<16x128xf32> -> vector<16x128xf32>
    %17 = vector.broadcast %14 : vector<16x1xf32> to vector<16x128xf32>
    %18 = vector.broadcast %3 : vector<1x128xf32> to vector<16x128xf32>
    %19 = arith.addf %17, %18 : vector<16x128xf32>
    %cst_10 = arith.constant 2.000000e+00 : f32
    %20 = vector.broadcast %cst_10 : f32 to vector<16x128xf32>
    %21 = arith.mulf %20, %16 : vector<16x128xf32>
    %22 = arith.subf %19, %21 : vector<16x128xf32>
    %cst_11 = arith.constant 0.000000e+00 : f32
    %23 = vector.broadcast %cst_11 : f32 to vector<16x128xf32>
    %24 = arith.maximumf %22, %23 : vector<16x128xf32>
    %25 = math.sqrt %24 : vector<16x128xf32>
    %cst_12 = arith.constant 0.000000e+00 : bf16
    %26 = vector.broadcast %cst_12 : bf16 to vector<16x128xbf16>
    %27 = arith.cmpf one, %0, %26 : vector<16x128xbf16>
    %cst_13 = arith.constant 5.000000e-01 : f32
    %28 = vector.broadcast %cst_13 : f32 to vector<16x128xf32>
    %29 = arith.mulf %25, %28 : vector<16x128xf32>
    %cst_14 = arith.constant -1.000000e+30 : f32
    %30 = vector.broadcast %cst_14 : f32 to vector<16x128xf32>
    %31 = arith.select %27, %29, %30 : vector<16x128xi1>, vector<16x128xf32>
    %cst_15 = arith.constant dense<0xFF800000> : vector<16xf32>
    %32 = vector.multi_reduction <maximumf>, %31, %cst_15 [1] : vector<16x128xf32> to vector<16xf32>
    %33 = vector.shape_cast %32 : vector<16xf32> to vector<16x1xf32>
    %34 = vector.broadcast %33 : vector<16x1xf32> to vector<16x128xf32>
    %35 = arith.subf %31, %34 : vector<16x128xf32>
    %36 = math.exp %35 : vector<16x128xf32>
    %37 = arith.extui %27 : vector<16x128xi1> to vector<16x128xi32>
    %38 = arith.sitofp %37 : vector<16x128xi32> to vector<16x128xf32>
    %39 = arith.mulf %36, %38 : vector<16x128xf32>
    %cst_16 = arith.constant dense<0.000000e+00> : vector<16xf32>
    %40 = vector.multi_reduction <add>, %39, %cst_16 [1] : vector<16x128xf32> to vector<16xf32>
    %41 = vector.shape_cast %40 : vector<16xf32> to vector<16x1xf32>
    %cst_17 = arith.constant 0.000000e+00 : f32
    %42 = vector.broadcast %cst_17 : f32 to vector<16x1xf32>
    %43 = arith.cmpf ole, %41, %42 : vector<16x1xf32>
    %cst_18 = arith.constant 1.000000e+00 : f32
    %44 = vector.broadcast %cst_18 : f32 to vector<16x1xf32>
    %45 = arith.select %43, %44, %41 : vector<16x1xi1>, vector<16x1xf32>
    %46 = tpu.reciprocal %45 {approx = true} : vector<16x1xf32> -> vector<16x1xf32>
    %47 = vector.broadcast %46 : vector<16x1xf32> to vector<16x128xf32>
    %48 = arith.mulf %39, %47 : vector<16x128xf32>
    %49 = arith.truncf %48 : vector<16x128xf32> to vector<16x128xbf16>
    %cst_19 = arith.constant dense<0.000000e+00> : vector<16x128xf32>
    %50 = tpu.matmul %49, %1, %cst_19 {dimension_numbers = #tpu.dot_dimension_numbers<[1], [0], [0], [1], [0, 0, 1, 1], [], []>} : vector<16x128xbf16>, vector<128x128xbf16>, vector<16x128xf32> -> vector<16x128xf32>
    %c0_20 = arith.constant 0 : index
    %c0_21 = arith.constant 0 : index
    %51 = vector.load %arg4[%c0_20, %c0_21] : memref<16x128xf32, #tpu.memory_space<vmem>>, vector<16x128xf32>
    tpu.vector_store %arg4[%c0_20, %c0_21], %50 {strides = array<i32>} : memref<16x128xf32, #tpu.memory_space<vmem>>, vector<16x128xf32>,
    return
  }
  func.func @transform_0(%arg0: i32) -> (i32, i32) {
    %c0_i32 = arith.constant 0 : i32
    %c0_i32_0 = arith.constant 0 : i32
    return %arg0, %c0_i32 : i32, i32
  }
  func.func @transform_1(%arg0: i32) -> (i32, i32) {
    %c0_i32 = arith.constant 0 : i32
    %c0_i32_0 = arith.constant 0 : i32
    %c0_i32_1 = arith.constant 0 : i32
    return %c0_i32, %c0_i32_0 : i32, i32
  }
  func.func @transform_2(%arg0: i32) -> (i32, i32) {
    %c0_i32 = arith.constant 0 : i32
    %c0_i32_0 = arith.constant 0 : i32
    %c0_i32_1 = arith.constant 0 : i32
    return %c0_i32, %c0_i32_0 : i32, i32
  }
  func.func @transform_3(%arg0: i32) -> (i32, i32) {
    %c0_i32 = arith.constant 0 : i32
    %c0_i32_0 = arith.constant 0 : i32
    return %arg0, %c0_i32 : i32, i32
  }
}

</mosaic_0001>

<bundles_post_ra>
// kernel: tpu_custom_call.1
= control target key start
LH: loop header
LB: loop body
LE: loop exit
PB: predicated region body
PF: predicated region fallthrough
CT: control target
= control target key end

     0   :  { %8 = vsyncpa [#allocation3], 0  ;;  %s723_s0 = inlined_call_operand.hbm [shape: bf16[16,128], index: 0, kind: input, shape index: {}]   ;;  %s724_s1 = inlined_call_operand.hbm [shape: bf16[128,128], index: 1, kind: input, shape index: {}]   ;;  %s725_s2 = inlined_call_operand.hbm [shape: f32[8,128], index: 2, kind: input, shape index: {}]   ;;  %s726_s3 = inlined_call_operand.hbm [shape: f32[16,128], index: 3, kind: output, shape index: {}]  }
   0x1   :  { %9 = vsyncpa [#allocation6], 0 }
   0x2   :  { %10 = vsyncpa [#allocation4], 0  ;;  %s581_s12 = smov [#allocation5]   ;;  %s582_s14 = smov [#allocation2]  }
   0x3   :  { %s28_s13 = sshll.u32 %s581_s12, 4  ;;  %s16_s15 = sshll.u32 %s582_s14, 4  ;;  %s29_s13 = int_to_ptr.vmem [resolvable:$true] %s28_s13  ;;  %s612_s15 = int_to_ptr.vmem [resolvable:$true] %s16_s15 }
   0x4   :  { %s487_s18 = scalar_lea.hbm %s724_s1, 1024 }
   0x5   :  { %p488_p0 = scmp.ne.s32.totalorder %s724_s1, %s487_s18  ;;  %p491_p1 = scmp.lt.u32.totalorder %s487_s18, %s724_s1 }
   0x7   :  { %p493_p2 = pnand %p491_p1, %p488_p0 }
   0x9   :  { %496 = shalt.err (!%p493_p2)
}
   0xa   :  { %s497_s23 = scalar_lea.vmem %s29_s13, 1024  ;;  %p502_p4 = scmp.lt.s32.totalorder %s29_s13, %s29_s13 }
   0xb   :  { %p498_p3 = scmp.ne.s32.totalorder %s29_s13, %s497_s23  ;;  %p503_p5 = scmp.lt.s32.totalorder %s497_s23, %s497_s23 }
   0xd   :  { %p504_p6 = por %p503_p5, %p502_p4 }
   0xf   :  { %p505_p7 = pnand %p504_p6, %p498_p3 }
  0x11   :  { %508 = shalt.err (!%p505_p7)
}
  0x12   :  { %s583_s24 = smov 64   ;;  %s584_s25 = smov 4  }
  0x13   :  { %34 = dma.hbm_to_vmem [thread:$0]  %s724_s1, 1024, %s29_s13, [#allocation6], %s583_s24, %s583_s24, %s584_s25  }
  0x14   :  { %s509_s30 = scalar_lea.hbm %s723_s0, 128 }
  0x15   :  { %p510_p8 = scmp.ne.s32.totalorder %s723_s0, %s509_s30  ;;  %p513_p9 = scmp.lt.u32.totalorder %s509_s30, %s723_s0 }
  0x17   :  { %p515_p10 = pnand %p513_p9, %p510_p8 }
  0x19   :  { %518 = shalt.err (!%p515_p10)
}
  0x1a   :  { %s519_s8 = scalar_lea.vmem %s612_s15, 128  ;;  %p524_p12 = scmp.lt.s32.totalorder %s612_s15, %s612_s15 }
  0x1b   :  { %p520_p11 = scmp.ne.s32.totalorder %s612_s15, %s519_s8  ;;  %p525_p13 = scmp.lt.s32.totalorder %s519_s8, %s519_s8 }
  0x1d   :  { %p526_p0 = por %p525_p13, %p524_p12 }
  0x1f   :  { %p527_p1 = pnand %p526_p0, %p520_p11 }
  0x21   :  { %530 = shalt.err (!%p527_p1)
}
  0x22   :  { %22 = dma.hbm_to_vmem [thread:$0]  %s723_s0, 128, %s612_s15, [#allocation3], %s583_s24, %s583_s24, %s584_s25  }
  0x23   :  { %s585_s10 = smov [#allocation7]   ;;  %s531_s14 = scalar_lea.hbm %s725_s2, 128 }
  0x24   :  { %s41_s11 = sshll.u32 %s585_s10, 4  ;;  %p532_p2 = scmp.ne.s32.totalorder %s725_s2, %s531_s14  ;;  %s42_s11 = int_to_ptr.vmem [resolvable:$true] %s41_s11 }
  0x25   :  { %p535_p3 = scmp.lt.u32.totalorder %s531_s14, %s725_s2 }
  0x27   :  { %p537_p4 = pnand %p535_p3, %p532_p2 }
  0x29   :  { %540 = shalt.err (!%p537_p4)
}
  0x2a   :  { %s541_s20 = scalar_lea.vmem %s42_s11, 128  ;;  %p546_p6 = scmp.lt.s32.totalorder %s42_s11, %s42_s11 }
  0x2b   :  { %p542_p5 = scmp.ne.s32.totalorder %s42_s11, %s541_s20  ;;  %p547_p7 = scmp.lt.s32.totalorder %s541_s20, %s541_s20 }
  0x2d   :  { %p548_p8 = por %p547_p7, %p546_p6 }
  0x2f   :  { %p549_p9 = pnand %p548_p8, %p542_p5 }
  0x31   :  { %552 = shalt.err (!%p549_p9)
}
  0x32   :  { %44 = dma.hbm_to_vmem [thread:$0]  %s725_s2, 128, %s42_s11, [#allocation6]  }
  0x33   :  { %575 = dma.done.wait [#allocation3], 128  }
  0x34   :  { %576 = vsyncadd [#allocation3], 4294967168 }
  0x35   :  { %577 = dma.done.wait [#allocation6], 1152  }
  0x36   :  { %578 = vsyncadd [#allocation6], 4294966144  ;;  %v586_v0 = vmov 0.0   ;;  %vm587_vm0 = vmmov 0   ;;  %v466_v1 = vld [vmem:[#allocation5] sm:$0xff]   ;;  %v467_v2 = vld [vmem:[#allocation5 + $0x8] sm:$0xff]   ;;  %v229_v20 = vlaneseq }
  0x37   :  { %395 = vmatprep.subr.bf16.mxu0 %v586_v0  ;;  %411 = vmatprep.mubr.msk.bf16.mxu0 %vm587_vm0, %v586_v0  ;;  %v468_v3 = vld [vmem:[#allocation5 + $0x10] sm:$0xff]   ;;  %v469_v4 = vld [vmem:[#allocation5 + $0x18] sm:$0xff]   ;;  %v470_v5 = vld [vmem:[#allocation5 + $0x20] sm:$0xff]   ;;  %v588_v46 = vmov 0   ;;  %s589_s2 = smov [#allocation8]  }
  0x38   :  { %415 = vmatprep.subr.bf16.mxu1 %v586_v0  ;;  %431 = vmatprep.mubr.msk.bf16.mxu1 %vm587_vm0, %v586_v0  ;;  %v471_v6 = vld [vmem:[#allocation5 + $0x28] sm:$0xff]   ;;  %v472_v7 = vld [vmem:[#allocation5 + $0x30] sm:$0xff]   ;;  %v473_v8 = vld [vmem:[#allocation5 + $0x38] sm:$0xff]   ;;  %v230_v24 = vshrl.u32 %v229_v20, 7  ;;  %s344_s21 = sshll.u32 %s589_s2, 4  ;;  %s345_s21 = int_to_ptr.vmem [resolvable:$true] %s344_s21 }
  0x39   :  { %396 = vmatpush3.bf16.msra.mxu0 %v466_v1  ;;  %416 = vmatpush3.bf16.xpose.msra.mxu1 %v466_v1  ;;  %v670_v9 = vld [vmem:[#allocation2] sm:$0xf]  ;;  %v672_v10 = vld [vmem:[#allocation2 + $0x4] sm:$0xf]  ;;  %v75_v29 = vld [vmem:[#allocation7] sm:$0xff]  ;;  %s553_s22 = scalar_lea.vmem %s345_s21, 256  ;;  %p558_p11 = scmp.lt.s32.totalorder %s345_s21, %s345_s21 }
  0x3a   :  { %397 = vmatprep.subr.bf16.mxu0 %v586_v0  ;;  %417 = vmatprep.subr.bf16.mxu1 %v586_v0  ;;  %v357_v11 = vcombine.low %v670_v9, %v672_v10  ;;  %v231_v27 = vsub.s32 0, %v230_v24  ;;  %vm255_vm1 = vcmp.ne.bf16.partialorder %v670_v9, 0  ;;  %vm256_vm2 = vcmp.ne.bf16.partialorder %v672_v10, 0  ;;  %p554_p10 = scmp.ne.s32.totalorder %s345_s21, %s553_s22  ;;  %p559_p12 = scmp.lt.s32.totalorder %s553_s22, %s553_s22 }
  0x3b   :  { %v259_v47 = vsel %vm255_vm1, 65537, %v588_v46  ;;  %v260_v48 = vsel %vm256_vm2, 65537, %v588_v46 }
  0x3c   :  { %v232_v31 = vrot.slane %v75_v29, %v231_v27  ;;  %v261_v50 = vunpack.c.l.b16 %v259_v47  ;;  %v262_v54 = vunpack.c.l.b16 %v260_v48  ;;  %p560_p13 = por %p559_p12, %p558_p11 }
  0x3d   :  { %398 = vmatpush3.bf16.msra.mxu0 %v467_v2 }
  0x3e   :  { %399 = vmatprep.subr.bf16.mxu0 %v586_v0  ;;  %vm693_vm5 = vcmp.ne.s32.totalorder %v261_v50, 0  ;;  %vm697_vm8 = vcmp.ne.s32.totalorder %v262_v54, 0  ;;  %p561_p0 = pnand %p560_p13, %p554_p10 }
  0x3f   :  { %v366_v10 = vsel %vm693_vm5, 1.0, %v586_v0 }
  0x41   :  { %400 = vmatpush3.bf16.msra.mxu0 %v468_v3  ;;  %418 = vmatpush3.bf16.xpose.msra.mxu1 %v467_v2 }
  0x42   :  { %401 = vmatprep.subr.bf16.mxu0 %v586_v0  ;;  %419 = vmatprep.subr.bf16.mxu1 %v586_v0 }
  0x45   :  { %402 = vmatpush3.bf16.msra.mxu0 %v469_v4 }
  0x46   :  { %403 = vmatprep.subr.bf16.mxu0 %v586_v0 }
  0x49   :  { %404 = vmatpush3.bf16.msra.mxu0 %v470_v5  ;;  %420 = vmatpush3.bf16.xpose.msra.mxu1 %v468_v3 }
  0x4a   :  { %405 = vmatprep.subr.bf16.mxu0 %v586_v0  ;;  %421 = vmatprep.subr.bf16.mxu1 %v586_v0 }
  0x4d   :  { %406 = vmatpush3.bf16.msra.mxu0 %v471_v6 }
  0x4e   :  { %407 = vmatprep.subr.bf16.mxu0 %v586_v0 }
  0x51   :  { %408 = vmatpush3.bf16.msra.mxu0 %v472_v7  ;;  %422 = vmatpush3.bf16.xpose.msra.mxu1 %v469_v4 }
  0x52   :  { %409 = vmatprep.subr.bf16.mxu0 %v586_v0  ;;  %423 = vmatprep.subr.bf16.mxu1 %v586_v0 }
  0x55   :  { %410 = vmatpush3.bf16.msra.mxu0 %v473_v8 }
  0x56   :  { %435 = vmatprep.subr.bf16.mxu0 %v586_v0 }
  0x58   :  { %412 = vmatmul.mubr.bf16.vlgmr.msra.gmra.mrb[0].mxu0 %v357_v11 }
  0x59   :  { %424 = vmatpush3.bf16.xpose.msra.mxu1 %v470_v5  ;;  %436 = vmatpush3.bf16.msra.mxu0 %v466_v1 }
  0x5a   :  { %425 = vmatprep.subr.bf16.mxu1 %v586_v0  ;;  %437 = vmatprep.subr.bf16.mxu0 %v586_v0 }
  0x5b   :  { %451 = vmatprep.mubr.msk.bf16.mxu0 %vm587_vm0, %v586_v0 }
  0x5d   :  { %438 = vmatpush3.bf16.msra.mxu0 %v467_v2 }
  0x5e   :  { %439 = vmatprep.subr.bf16.mxu0 %v586_v0 }
  0x61   :  { %426 = vmatpush3.bf16.xpose.msra.mxu1 %v471_v6  ;;  %440 = vmatpush3.bf16.msra.mxu0 %v468_v3 }
  0x62   :  { %427 = vmatprep.subr.bf16.mxu1 %v586_v0  ;;  %441 = vmatprep.subr.bf16.mxu0 %v586_v0 }
  0x65   :  { %442 = vmatpush3.bf16.msra.mxu0 %v469_v4 }
  0x66   :  { %443 = vmatprep.subr.bf16.mxu0 %v586_v0 }
  0x69   :  { %428 = vmatpush3.bf16.xpose.msra.mxu1 %v472_v7  ;;  %444 = vmatpush3.bf16.msra.mxu0 %v470_v5 }
  0x6a   :  { %429 = vmatprep.subr.bf16.mxu1 %v586_v0  ;;  %445 = vmatprep.subr.bf16.mxu0 %v586_v0 }
  0x6d   :  { %446 = vmatpush3.bf16.msra.mxu0 %v471_v6 }
  0x6e   :  { %447 = vmatprep.subr.bf16.mxu0 %v586_v0 }
  0x71   :  { %430 = vmatpush3.bf16.xpose.msra.mxu1 %v473_v8  ;;  %448 = vmatpush3.bf16.msra.mxu0 %v472_v7 }
  0x72   :  { %449 = vmatprep.subr.bf16.mxu0 %v586_v0 }
  0x75   :  { %450 = vmatpush3.bf16.msra.mxu0 %v473_v8 }
 0x12b   :  { %v164_v12 = vpop.f32.mrb[0].mxu0 }
 0x12c   :  { %177 = vadd.xlane.f32.xlu0 %v164_v12  ;;  %v413_v13 = vpop.f32.mrb[1].mxu0  ;;  %v171_v14 = vmul.f32 %v164_v12, %v164_v12 }
 0x12d   :  { %v167_v15 = vpop.f32.mrb[2].mxu0 }
 0x12e   :  { %v187_v16 = vpack.c.bf16 %v167_v15, %v164_v12  ;;  %173 = vadd.xlane.f32.xlu1 %v171_v14  ;;  %v414_v17 = vpop.f32.mrb[3].mxu0  ;;  %v172_v18 = vmul.f32 %v167_v15, %v167_v15  ;;  %v367_v12 = vsel %vm697_vm8, 1.0, %v586_v0 }
 0x130   :  { %179 = vadd.xlane.f32.xlu0 %v167_v15  ;;  %432 = vmatmul.mubr.bf16.vlgmr.msra.gmra.mrb[0].mxu1 %v187_v16 }
 0x132   :  { %175 = vadd.xlane.f32.xlu1 %v172_v18 }
 0x1b9   :  { %v178_v19 = vpop.xlane.xlu0 %177 }
 0x1ba   :  { %v181_v23 = vmul.f32 2e-06, %v178_v19 }
 0x1bb   :  { %v174_v21 = vpop.xlane.xlu1 %173 }
 0x1bc   :  { %v183_v28 = vsub.f32 %v174_v21, %v181_v23 }
 0x1bd   :  { %v180_v22 = vpop.xlane.xlu0 %179 }
 0x1be   :  { %v182_v25 = vmul.f32 2e-06, %v180_v22  ;;  %v185_v32 = vadd.f32 1.28e-10, %v183_v28 }
 0x1bf   :  { %v176_v26 = vpop.xlane.xlu1 %175 }
 0x1c0   :  { %v184_v30 = vsub.f32 %v176_v26, %v182_v25  ;;  %v233_v35 = vadd.f32 %v232_v31, %v185_v32 }
 0x1c2   :  { %v186_v33 = vadd.f32 1.28e-10, %v184_v30 }
 0x1c4   :  { %v234_v39 = vadd.f32 %v232_v31, %v186_v33 }
 0x203   :  { %v222_v34 = vpop.f32.mrb[0].mxu1 }
 0x204   :  { %v235_v36 = vmul.f32 2.0, %v222_v34  ;;  %v433_v37 = vpop.f32.mrb[1].mxu1 }
 0x205   :  { %v225_v38 = vpop.f32.mrb[2].mxu1 }
 0x206   :  { %v237_v40 = vsub.f32 %v233_v35, %v235_v36  ;;  %v236_v41 = vmul.f32 2.0, %v225_v38  ;;  %v434_v42 = vpop.f32.mrb[3].mxu1 }
 0x208   :  { %v239_v43 = vmax.f32 %v237_v40, 0.0  ;;  %v238_v44 = vsub.f32 %v234_v39, %v236_v41 }
 0x20a   :  { %v240_v45 = vmax.f32 %v238_v44, 0.0  ;;  %475 = vrsqrt.f32 %v239_v43  ;;  %vm243_vm3 = vcmp.eq.f32.partialorder %v239_v43, inf  ;;  %v246_v53 = vand.u32 2147483648, %v239_v43 }
 0x20b   :  { %vm245_vm4 = vcmp.eq.f32.partialorder %v239_v43, 0.0 }
 0x20c   :  { %477 = vrsqrt.f32 %v240_v45  ;;  %vm250_vm6 = vcmp.eq.f32.partialorder %v240_v45, inf  ;;  %v253_v59 = vand.u32 2147483648, %v240_v45  ;;  %vm252_vm7 = vcmp.eq.f32.partialorder %v240_v45, 0.0 }
 0x214   :  { %v476_v49 = vpop.eup %475 }
 0x215   :  { %v242_v51 = vmul.f32 %v476_v49, %v239_v43 }
 0x216   :  { %v478_v52 = vpop.eup %477 }
 0x217   :  { %v244_v55 = vsel %vm243_vm3, %v239_v43, %v242_v51  ;;  %v249_v56 = vmul.f32 %v478_v52, %v240_v45 }
 0x218   :  { %v247_v57 = vsel %vm245_vm4, %v246_v53, %v244_v55 }
 0x219   :  { %v257_v60 = vmul.f32 0.5, %v247_v57  ;;  %v251_v61 = vsel %vm250_vm6, %v240_v45, %v249_v56 }
 0x21a   :  { %v254_v62 = vsel %vm252_vm7, %v253_v59, %v251_v61 }
 0x21b   :  { %v265_v1 = vsel %vm693_vm5, %v257_v60, -1e+30  ;;  %v258_v2 = vmul.f32 0.5, %v254_v62 }
 0x21c   :  { %267 = vmax.xlane.f32.xlu0 %v265_v1 }
 0x21d   :  { %v266_v3 = vsel %vm697_vm8, %v258_v2, -1e+30 }
 0x21e   :  { %269 = vmax.xlane.f32.xlu1 %v266_v3 }
 0x2a9   :  { %v268_v4 = vpop.xlane.xlu0 %267 }
 0x2aa   :  { %v271_v5 = vsub.f32 %v265_v1, %v268_v4 }
 0x2ab   :  { %v270_v6 = vpop.xlane.xlu1 %269 }
 0x2ac   :  { %v273_v7 = vmul.f32 1.442695, %v271_v5  ;;  %v272_v8 = vsub.f32 %v266_v3, %v270_v6 }
 0x2ae   :  { %479 = vpow2.f32 %v273_v7  ;;  %v275_v9 = vmul.f32 1.442695, %v272_v8 }
 0x2b0   :  { %481 = vpow2.f32 %v275_v9 }
 0x2b8   :  { %v480_v11 = vpop.eup %479 }
 0x2b9   :  { %v281_v13 = vmul.f32 %v480_v11, %v366_v10 }
 0x2ba   :  { %v482_v14 = vpop.eup %481 }
 0x2bb   :  { %283 = vadd.xlane.f32.xlu0 %v281_v13  ;;  %v282_v15 = vmul.f32 %v482_v14, %v367_v12 }
 0x2bd   :  { %285 = vadd.xlane.f32.xlu1 %v282_v15 }
 0x348   :  { %v284_v16 = vpop.xlane.xlu0 %283 }
 0x349   :  { %vm287_vm9 = vcmp.le.f32.partialorder %v284_v16, 0.0 }
 0x34a   :  { %v289_v17 = vsel %vm287_vm9, 1.0, %v284_v16  ;;  %v286_v18 = vpop.xlane.xlu1 %285 }
 0x34b   :  { %483 = vrcp.f32 %v289_v17  ;;  %vm288_vm10 = vcmp.le.f32.partialorder %v286_v18, 0.0 }
 0x34c   :  { %v290_v19 = vsel %vm288_vm10, 1.0, %v286_v18 }
 0x34d   :  { %485 = vrcp.f32 %v290_v19 }
 0x355   :  { %v484_v20 = vpop.eup %483 }
 0x356   :  { %v293_v22 = vmul.f32 %v484_v20, %v281_v13 }
 0x357   :  { %v486_v21 = vpop.eup %485 }
 0x358   :  { %v294_v23 = vmul.f32 %v486_v21, %v282_v15 }
 0x35a   :  { %v295_v24 = vpack.c.bf16 %v294_v23, %v293_v22 }
 0x35c   :  { %452 = vmatmul.mubr.bf16.vlgmr.msra.gmra.mrb[4].mxu0 %v295_v24 }
 0x42f   :  { %v330_v0 = vpop.f32.mrb[4].mxu0 }
 0x430   :  { %337 = vst [vmem:[#allocation8] sm:$0xff] %v330_v0  ;;  %v453_v25 = vpop.f32.mrb[5].mxu0 }
 0x431   :  { %v333_v26 = vpop.f32.mrb[6].mxu0 }
 0x432   :  { %338 = vst [vmem:[#allocation8 + $0x8] sm:$0xff] %v333_v26  ;;  %v454_v27 = vpop.f32.mrb[7].mxu0 }
 0x433   :  { %564 = shalt.err (!%p561_p0)
}
 0x434   :  { %s565_s25 = scalar_lea.hbm %s726_s3, 256 }
 0x435   :  { %p566_p1 = scmp.ne.s32.totalorder %s726_s3, %s565_s25  ;;  %p569_p2 = scmp.lt.u32.totalorder %s565_s25, %s726_s3 }
 0x437   :  { %p571_p3 = pnand %p569_p2, %p566_p1 }
 0x439   :  { %574 = shalt.err (!%p571_p3)
}
 0x43a   :  { %s590_s30 = smov 128   ;;  %s591_s4 = smov 8  }
 0x43b   :  { %350 = dma.vmem_to_hbm [thread:$0]  %s345_s21, 256, %s726_s3, [#allocation4], %s590_s30, %s590_s30, %s591_s4  }
 0x43c   :  { %579 = dma.done.wait [#allocation4], 256  }
 0x43d   :  { %580 = vsyncadd [#allocation4], 4294967040 }
 0x43e   :  { %354 = vsyncpa [#allocation3], 1 }
 0x43f   :  { %355 = vsyncpa [#allocation6], 1 }
 0x440   :  { %356 = vsyncpa [#allocation4], 1 }

</bundles_post_ra>
